<compile_context>
chip_gen: v6e
topology: v6e:2x2x1
jax: 0.10.0
libtpu: 0.0.40
codegen_flags: <defaults>
</compile_context>

<pallas_src>
import math
from functools import partial

import jax
import jax.numpy as jnp
from jax.experimental import pallas as pl
from jax.experimental.pallas import tpu as pltpu


# ----------------------------------------------------------------------------
# Flash multi-head attention kernel
# ----------------------------------------------------------------------------
def _flash_mha_kernel(*refs, heads, head_dim, scale, causal, has_mask,
                      block_q, block_k):
    if has_mask:
        q_ref, k_ref, v_ref, mask_ref, o_ref, m_ref, l_ref, acc_ref = refs
    else:
        q_ref, k_ref, v_ref, o_ref, m_ref, l_ref, acc_ref = refs
        mask_ref = None

    qi = pl.program_id(1)
    ki = pl.program_id(2)

    @pl.when(ki == 0)
    def _init():
        m_ref[...] = jnp.full(m_ref.shape, -jnp.inf, dtype=m_ref.dtype)
        l_ref[...] = jnp.zeros(l_ref.shape, dtype=l_ref.dtype)
        acc_ref[...] = jnp.zeros(acc_ref.shape, dtype=acc_ref.dtype)

    def _compute():
        # Fold the 1/sqrt(d) scale into q: O(tq*D) multiplies, not O(tq*tk).
        q = q_ref[0] * scale                     # (tq, D), input dtype
        k = k_ref[0]                             # (tk, D)
        v = v_ref[0]                             # (tk, D)

        # Additive bias tile, shared by every head (hoisted out of head loop).
        if has_mask:
            bias = mask_ref[0].astype(jnp.float32) * jnp.float32(-10000.0)
        elif causal:
            row = qi * block_q + jax.lax.broadcasted_iota(
                jnp.int32, (block_q, block_k), 0)
            col = ki * block_k + jax.lax.broadcasted_iota(
                jnp.int32, (block_q, block_k), 1)
            bias = jnp.where(col > row, jnp.float32(-10000.0), jnp.float32(0.0))
        else:
            bias = None

        for h in range(heads):
            sl = slice(h * head_dim, (h + 1) * head_dim)
            # QK^T on the MXU, contracting the last dims (no explicit k.T).
            s = jax.lax.dot_general(
                q[:, sl], k[:, sl],
                dimension_numbers=(((1,), (1,)), ((), ())),
                preferred_element_type=jnp.float32)          # (tq, tk) f32
            if bias is not None:
                s = s + bias

            # Online softmax update (statistics kept in f32).
            m_prev = m_ref[h]                                # (tq, 1)
            m_new = jnp.maximum(m_prev, jnp.max(s, axis=-1, keepdims=True))
            alpha = jnp.exp(m_prev - m_new)
            p = jnp.exp(s - m_new)
            l_ref[h] = alpha * l_ref[h] + jnp.sum(p, axis=-1, keepdims=True)
            acc_ref[h] = alpha * acc_ref[h] + jnp.dot(
                p.astype(v.dtype), v[:, sl],
                preferred_element_type=jnp.float32)
            m_ref[h] = m_new

    if causal and not has_mask:
        # Skip KV tiles that lie entirely above the causal diagonal.
        pl.when(ki * block_k <= qi * block_q + (block_q - 1))(_compute)
    else:
        _compute()

    @pl.when(ki == pl.num_programs(2) - 1)
    def _finalize():
        # The HBM write is one lane-dense (tq, D) block; per-head normalized
        # slabs are stored into the resident output tile.
        for h in range(heads):
            inv = pl.reciprocal(l_ref[h], approx=True)       # EUP slot
            o_ref[0, :, h * head_dim:(h + 1) * head_dim] = (
                acc_ref[h] * inv).astype(o_ref.dtype)


def _pick_block(total, target, align):
    """Largest tile <= target that divides `total` and is a multiple of
    `align`; falls back to the full extent (full-dim blocks are always legal)."""
    if total <= target:
        return total
    t = (target // align) * align
    while t >= align:
        if total % t == 0:
            return t
        t -= align
    return total


def multi_head_attention(q, k, v, mask=None, *, heads, causal=False,
                         block_q=256, block_k=512):
    """Flash multi-head attention.

    q: [B, Sq, D], k/v: [B, Sk, D], optional additive mask [B, Sq, Sk]
    (1.0 where masked; scaled by -10000 like the PyTorch module).
    `causal=True` (with mask=None) generates the causal mask in-kernel.
    Returns [B, Sq, D].
    """
    B, Sq, D = q.shape
    Bk, Sk, Dk = k.shape
    assert D % heads == 0 and Dk == D and v.shape == k.shape and Bk == B
    d = D // heads
    scale = 1.0 / math.sqrt(d)

    bq = _pick_block(Sq, block_q, 8)
    # With an explicit mask the KV tile is also the lane dim of the mask
    # block, so it must be a multiple of 128 (or the full extent).
    bk = _pick_block(Sk, block_k, 128 if mask is not None else 8)

    grid = (B, Sq // bq, Sk // bk)
    has_mask = mask is not None

    in_specs = [
        pl.BlockSpec((1, bq, D), lambda b, qi, ki: (b, qi, 0)),    # q
        pl.BlockSpec((1, bk, D), lambda b, qi, ki: (b, ki, 0)),    # k
        pl.BlockSpec((1, bk, D), lambda b, qi, ki: (b, ki, 0)),    # v
    ]
    inputs = [q, k, v]
    if has_mask:
        in_specs.append(
            pl.BlockSpec((1, bq, bk), lambda b, qi, ki: (b, qi, ki)))  # mask
        inputs.append(mask)

    kernel = partial(_flash_mha_kernel, heads=heads, head_dim=d, scale=scale,
                     causal=causal, has_mask=has_mask, block_q=bq, block_k=bk)

    return pl.pallas_call(
        kernel,
        out_shape=jax.ShapeDtypeStruct((B, Sq, D), q.dtype),
        grid_spec=pltpu.PrefetchScalarGridSpec(
            num_scalar_prefetch=0,
            grid=grid,
            in_specs=in_specs,
            out_specs=pl.BlockSpec((1, bq, D), lambda b, qi, ki: (b, qi, 0)),
            scratch_shapes=[
                pltpu.VMEM((heads, bq, 1), jnp.float32),    # running max m
                pltpu.VMEM((heads, bq, 1), jnp.float32),    # running sum l
                pltpu.VMEM((heads, bq, d), jnp.float32),    # output accumulator
            ]),
        compiler_params=pltpu.CompilerParams(
            dimension_semantics=("parallel", "parallel", "arbitrary")),
    )(*inputs)


# ----------------------------------------------------------------------------
# AttentionLayer (projections + attention + output linear + past)
# ----------------------------------------------------------------------------
def init_attention_layer_params(key, dims, dtype=jnp.float32):
    keys = jax.random.split(key, 8)
    bound = 1.0 / math.sqrt(dims)

    def linear(kw, kb):
        w = jax.random.uniform(kw, (dims, dims), dtype, -bound, bound)
        b = jax.random.uniform(kb, (dims,), dtype, -bound, bound)
        return (w, b)

    return {
        "proj_q": linear(keys[0], keys[1]),
        "proj_k": linear(keys[2], keys[3]),
        "proj_v": linear(keys[4], keys[5]),
        "linear": linear(keys[6], keys[7]),
    }


def _dense(x, wb):
    # nn.Linear equivalent (weights stored already-transposed: y = x @ W + b).
    w, b = wb
    return jnp.dot(x, w) + b


def attention_layer(params, q, k, v, past=None, mask=None, *, heads,
                    causal=False):
    """Pallas implementation of AttentionLayer.forward.

    Returns (x, (k, v)) like the PyTorch module (dropout == identity).
    The dense projections are plain GEMMs left to XLA (they lower straight to
    the MXU); the attention core runs in the Pallas flash kernel.
    """
    q = _dense(q, params["proj_q"])
    k = _dense(k, params["proj_k"])
    v = _dense(v, params["proj_v"])
    if past is not None:
        k = jnp.concatenate((past[0], k), axis=-2)
        v = jnp.concatenate((past[1], v), axis=-2)
    x = multi_head_attention(q, k, v, mask=mask, heads=heads, causal=causal)
    x = _dense(x, params["linear"])
    return x, (k, v)


# ----------------------------------------------------------------------------
# Pure-JAX reference (mirrors the PyTorch module, dropout = identity)
# ----------------------------------------------------------------------------
def _reference_attention_layer(params, q, k, v, past=None, mask=None, *, heads):
    q = _dense(q, params["proj_q"])
    k = _dense(k, params["proj_k"])
    v = _dense(v, params["proj_v"])
    if past is not None:
        k = jnp.concatenate((past[0], k), axis=-2)
        v = jnp.concatenate((past[1], v), axis=-2)
    B, Sq, D = q.shape
    d = D // heads

    def split(x):
        return x.reshape(x.shape[0], x.shape[1], heads, d).transpose(0, 2, 1, 3)

    qh, kh, vh = split(q), split(k), split(v)
    scores = jnp.einsum("bhqd,bhkd->bhqk", qh, kh) / math.sqrt(d)
    if mask is not None:
        scores = scores + mask[:, None, :, :].astype(scores.dtype) * (-10000.0)
    p = jax.nn.softmax(scores, axis=-1)
    o = jnp.einsum("bhqk,bhkd->bhqd", p, vh)
    o = o.transpose(0, 2, 1, 3).reshape(B, Sq, D)
    x = _dense(o, params["linear"])
    return x, (k, v)


if __name__ == "__main__":
    key = jax.random.PRNGKey(0)
    kq, kk, kv, kp = jax.random.split(key, 4)

    B, S, D, H = 2, 8, 32, 4   # batch=2, seq=8, hidden=32, heads=4

    q = jax.random.normal(kq, (B, S, D), dtype=jnp.float32)
    k = jax.random.normal(kk, (B, S, D), dtype=jnp.float32)
    v = jax.random.normal(kv, (B, S, D), dtype=jnp.float32)
    params = init_attention_layer_params(kp, D)

    # Causal mask in the PyTorch convention: 1.0 where masked, else 0.0.
    causal = (jnp.arange(S)[None, :] > jnp.arange(S)[:, None]).astype(jnp.float32)
    mask = jnp.broadcast_to(causal, (B, S, S))

    # 1) structural causal mask generated in-kernel (no mask DMA at all)
    out_causal, (k_out, v_out) = attention_layer(
        params, q, k, v, mask=None, causal=True, heads=H)
    # 2) explicit additive mask streamed as (tq, tk) tiles
    out_masked, _ = attention_layer(params, q, k, v, mask=mask, heads=H)
    # 3) no mask at all (specialized kernel variant without a mask operand)
    out_nomask, _ = attention_layer(params, q, k, v, heads=H)
    jax.block_until_ready((out_causal, out_masked, out_nomask))

    ref_masked, (k_expect, v_expect) = _reference_attention_layer(
        params, q, k, v, mask=mask, heads=H)
    ref_nomask, _ = _reference_attention_layer(params, q, k, v, mask=None, heads=H)

    assert out_causal.shape == (B, S, D)
    # Tolerance accounts for approx EUP reciprocal + flash-softmax reordering.
    tol = dict(atol=2e-2, rtol=2e-2)
    assert jnp.allclose(out_causal, ref_masked, **tol), "causal path mismatch"
    assert jnp.allclose(out_masked, ref_masked, **tol), "explicit-mask path mismatch"
    assert jnp.allclose(out_nomask, ref_nomask, **tol), "no-mask path mismatch"
    assert jnp.allclose(k_out, k_expect) and jnp.allclose(v_out, v_expect)

    print("KERNEL_OK")
</pallas_src>

<mosaic_0001>
module attributes {stable_mosaic.version = 11 : i64} {
  func.func @_flash_mha_kernel(%arg0: i32, %arg1: i32, %arg2: i32, %arg3: memref<1x8x32xf32, #tpu.memory_space<vmem>>, %arg4: memref<1x8x32xf32, #tpu.memory_space<vmem>>, %arg5: memref<1x8x32xf32, #tpu.memory_space<vmem>>, %arg6: memref<1x8x32xf32, #tpu.memory_space<vmem>>, %arg7: memref<4x8x1xf32, #tpu.memory_space<vmem>>, %arg8: memref<4x8x1xf32, #tpu.memory_space<vmem>>, %arg9: memref<4x8x8xf32, #tpu.memory_space<vmem>>) attributes {dimension_semantics = [#tpu.dimension_semantics<parallel>, #tpu.dimension_semantics<parallel>, #tpu.dimension_semantics<arbitrary>], iteration_bounds = array<i64: 2, 1, 1>, scalar_prefetch = 0 : i64, scratch_operands = 3 : i64, tpu.core_type = #tpu.core_type<tc>, window_params = [{transform_indices = @transform_0, window_bounds = array<i64: 1, 8, 32>}, {transform_indices = @transform_1, window_bounds = array<i64: 1, 8, 32>}, {transform_indices = @transform_2, window_bounds = array<i64: 1, 8, 32>}, {transform_indices = @transform_3, window_bounds = array<i64: 1, 8, 32>}]} {
    %c0_i32 = arith.constant 0 : i32
    %0 = arith.cmpi eq, %arg2, %c0_i32 : i32
    %1 = arith.extui %0 : i1 to i32
    %c0_i32_0 = arith.constant 0 : i32
    %2 = arith.cmpi ne, %1, %c0_i32_0 : i32
    scf.if %2 {
      %cst = arith.constant 0xFF800000 : f32
      %12 = vector.broadcast %cst : f32 to vector<4x8x1xf32>
      %c0 = arith.constant 0 : index
      %c0_5 = arith.constant 0 : index
      %c0_6 = arith.constant 0 : index
      %13 = vector.load %arg7[%c0, %c0_5, %c0_6] : memref<4x8x1xf32, #tpu.memory_space<vmem>>, vector<4x8x1xf32>
      tpu.vector_store %arg7[%c0, %c0_5, %c0_6], %12 {strides = array<i32>} : memref<4x8x1xf32, #tpu.memory_space<vmem>>, vector<4x8x1xf32>,
      %cst_7 = arith.constant 0.000000e+00 : f32
      %14 = vector.broadcast %cst_7 : f32 to vector<4x8x1xf32>
      %c0_8 = arith.constant 0 : index
      %c0_9 = arith.constant 0 : index
      %c0_10 = arith.constant 0 : index
      %15 = vector.load %arg8[%c0_8, %c0_9, %c0_10] : memref<4x8x1xf32, #tpu.memory_space<vmem>>, vector<4x8x1xf32>
      tpu.vector_store %arg8[%c0_8, %c0_9, %c0_10], %14 {strides = array<i32>} : memref<4x8x1xf32, #tpu.memory_space<vmem>>, vector<4x8x1xf32>,
      %cst_11 = arith.constant 0.000000e+00 : f32
      %16 = vector.broadcast %cst_11 : f32 to vector<4x8x8xf32>
      %c0_12 = arith.constant 0 : index
      %c0_13 = arith.constant 0 : index
      %c0_14 = arith.constant 0 : index
      %17 = vector.load %arg9[%c0_12, %c0_13, %c0_14] : memref<4x8x8xf32, #tpu.memory_space<vmem>>, vector<4x8x8xf32>
      tpu.vector_store %arg9[%c0_12, %c0_13, %c0_14], %16 {strides = array<i32>} : memref<4x8x8xf32, #tpu.memory_space<vmem>>, vector<4x8x8xf32>,
    } else {
    }
    %c8_i32 = arith.constant 8 : i32
    %3 = arith.muli %arg2, %c8_i32 : i32
    %c8_i32_1 = arith.constant 8 : i32
    %4 = arith.muli %arg1, %c8_i32_1 : i32
    %c7_i32 = arith.constant 7 : i32
    %5 = arith.addi %4, %c7_i32 : i32
    %6 = arith.cmpi sle, %3, %5 : i32
    %7 = arith.extui %6 : i1 to i32
    %c0_i32_2 = arith.constant 0 : i32
    %8 = arith.cmpi ne, %7, %c0_i32_2 : i32
    scf.if %8 {
      %c0 = arith.constant 0 : index
      %c0_5 = arith.constant 0 : index
      %c0_6 = arith.constant 0 : index
      %12 = vector.load %arg3[%c0, %c0_5, %c0_6] : memref<1x8x32xf32, #tpu.memory_space<vmem>>, vector<1x8x32xf32>
      %13 = vector.shape_cast %12 : vector<1x8x32xf32> to vector<8x32xf32>
      %cst = arith.constant 0.353553385 : f32
      %14 = vector.broadcast %cst : f32 to vector<8x32xf32>
      %15 = arith.mulf %13, %14 : vector<8x32xf32>
      %c0_7 = arith.constant 0 : index
      %c0_8 = arith.constant 0 : index
      %c0_9 = arith.constant 0 : index
      %16 = vector.load %arg4[%c0_7, %c0_8, %c0_9] : memref<1x8x32xf32, #tpu.memory_space<vmem>>, vector<1x8x32xf32>
      %17 = vector.shape_cast %16 : vector<1x8x32xf32> to vector<8x32xf32>
      %c0_10 = arith.constant 0 : index
      %c0_11 = arith.constant 0 : index
      %c0_12 = arith.constant 0 : index
      %18 = vector.load %arg5[%c0_10, %c0_11, %c0_12] : memref<1x8x32xf32, #tpu.memory_space<vmem>>, vector<1x8x32xf32>
      %19 = vector.shape_cast %18 : vector<1x8x32xf32> to vector<8x32xf32>
      %c8_i32_13 = arith.constant 8 : i32
      %20 = arith.muli %arg1, %c8_i32_13 : i32
      %21 = tpu.iota {dimensions = array<i32: 0>} : vector<8x8xi32>
      %22 = vector.broadcast %20 : i32 to vector<8x8xi32>
      %23 = arith.addi %22, %21 : vector<8x8xi32>
      %c8_i32_14 = arith.constant 8 : i32
      %24 = arith.muli %arg2, %c8_i32_14 : i32
      %25 = tpu.iota {dimensions = array<i32: 1>} : vector<8x8xi32>
      %26 = vector.broadcast %24 : i32 to vector<8x8xi32>
      %27 = arith.addi %26, %25 : vector<8x8xi32>
      %28 = arith.cmpi sgt, %27, %23 : vector<8x8xi32>
      %cst_15 = arith.constant -1.000000e+04 : f32
      %cst_16 = arith.constant 0.000000e+00 : f32
      %29 = vector.broadcast %cst_15 : f32 to vector<8x8xf32>
      %30 = vector.broadcast %cst_16 : f32 to vector<8x8xf32>
      %31 = arith.select %28, %29, %30 : vector<8x8xi1>, vector<8x8xf32>
      %32 = vector.extract_strided_slice %15 {offsets = [0, 0], sizes = [8, 8], strides = [1, 1]} : vector<8x32xf32> to vector<8x8xf32>
      %33 = vector.extract_strided_slice %17 {offsets = [0, 0], sizes = [8, 8], strides = [1, 1]} : vector<8x32xf32> to vector<8x8xf32>
      %cst_17 = arith.constant dense<0.000000e+00> : vector<8x8xf32>
      %34 = tpu.matmul %32, %33, %cst_17 {dimension_numbers = #tpu.dot_dimension_numbers<[1], [1], [0], [0], [0, 0, 1, 0], [], []>} : vector<8x8xf32>, vector<8x8xf32>, vector<8x8xf32> -> vector<8x8xf32>
      %35 = arith.addf %34, %31 : vector<8x8xf32>
      %c0_18 = arith.constant 0 : index
      %c0_19 = arith.constant 0 : index
      %c0_20 = arith.constant 0 : index
      %36 = vector.load %arg7[%c0_18, %c0_19, %c0_20] : memref<4x8x1xf32, #tpu.memory_space<vmem>>, vector<1x8x1xf32>
      %37 = vector.shape_cast %36 : vector<1x8x1xf32> to vector<8x1xf32>
      %cst_21 = arith.constant dense<0xFF800000> : vector<8xf32>
      %38 = vector.multi_reduction <maximumf>, %35, %cst_21 [1] : vector<8x8xf32> to vector<8xf32>
      %39 = vector.shape_cast %38 : vector<8xf32> to vector<8x1xf32>
      %40 = arith.maximumf %37, %39 : vector<8x1xf32>
      %41 = arith.subf %37, %40 : vector<8x1xf32>
      %42 = math.exp %41 : vector<8x1xf32>
      %43 = vector.broadcast %40 : vector<8x1xf32> to vector<8x8xf32>
      %44 = arith.subf %35, %43 : vector<8x8xf32>
      %45 = math.exp %44 : vector<8x8xf32>
      %c0_22 = arith.constant 0 : index
      %c0_23 = arith.constant 0 : index
      %c0_24 = arith.constant 0 : index
      %46 = vector.load %arg8[%c0_22, %c0_23, %c0_24] : memref<4x8x1xf32, #tpu.memory_space<vmem>>, vector<1x8x1xf32>
      %47 = vector.shape_cast %46 : vector<1x8x1xf32> to vector<8x1xf32>
      %48 = arith.mulf %42, %47 : vector<8x1xf32>
      %cst_25 = arith.constant dense<0.000000e+00> : vector<8xf32>
      %49 = vector.multi_reduction <add>, %45, %cst_25 [1] : vector<8x8xf32> to vector<8xf32>
      %50 = vector.shape_cast %49 : vector<8xf32> to vector<8x1xf32>
      %51 = arith.addf %48, %50 : vector<8x1xf32>
      %c0_26 = arith.constant 0 : index
      %c0_27 = arith.constant 0 : index
      %c0_28 = arith.constant 0 : index
      %52 = vector.load %arg8[%c0_26, %c0_27, %c0_28] : memref<4x8x1xf32, #tpu.memory_space<vmem>>, vector<1x8x1xf32>
      %53 = vector.shape_cast %52 : vector<1x8x1xf32> to vector<8x1xf32>
      %54 = vector.shape_cast %51 : vector<8x1xf32> to vector<1x8x1xf32>
      tpu.vector_store %arg8[%c0_26, %c0_27, %c0_28], %54 {strides = array<i32>} : memref<4x8x1xf32, #tpu.memory_space<vmem>>, vector<1x8x1xf32>,
      %c0_29 = arith.constant 0 : index
      %c0_30 = arith.constant 0 : index
      %c0_31 = arith.constant 0 : index
      %55 = vector.load %arg9[%c0_29, %c0_30, %c0_31] : memref<4x8x8xf32, #tpu.memory_space<vmem>>, vector<1x8x8xf32>
      %56 = vector.shape_cast %55 : vector<1x8x8xf32> to vector<8x8xf32>
      %57 = vector.broadcast %42 : vector<8x1xf32> to vector<8x8xf32>
      %58 = arith.mulf %57, %56 : vector<8x8xf32>
      %59 = vector.extract_strided_slice %19 {offsets = [0, 0], sizes = [8, 8], strides = [1, 1]} : vector<8x32xf32> to vector<8x8xf32>
      %cst_32 = arith.constant dense<0.000000e+00> : vector<8x8xf32>
      %60 = tpu.matmul %45, %59, %cst_32 {dimension_numbers = #tpu.dot_dimension_numbers<[1], [0], [0], [1], [0, 0, 1, 1], [], []>} : vector<8x8xf32>, vector<8x8xf32>, vector<8x8xf32> -> vector<8x8xf32>
      %61 = arith.addf %58, %60 : vector<8x8xf32>
      %c0_33 = arith.constant 0 : index
      %c0_34 = arith.constant 0 : index
      %c0_35 = arith.constant 0 : index
      %62 = vector.load %arg9[%c0_33, %c0_34, %c0_35] : memref<4x8x8xf32, #tpu.memory_space<vmem>>, vector<1x8x8xf32>
      %63 = vector.shape_cast %62 : vector<1x8x8xf32> to vector<8x8xf32>
      %64 = vector.shape_cast %61 : vector<8x8xf32> to vector<1x8x8xf32>
      tpu.vector_store %arg9[%c0_33, %c0_34, %c0_35], %64 {strides = array<i32>} : memref<4x8x8xf32, #tpu.memory_space<vmem>>, vector<1x8x8xf32>,
      %c0_36 = arith.constant 0 : index
      %c0_37 = arith.constant 0 : index
      %c0_38 = arith.constant 0 : index
      %65 = vector.load %arg7[%c0_36, %c0_37, %c0_38] : memref<4x8x1xf32, #tpu.memory_space<vmem>>, vector<1x8x1xf32>
      %66 = vector.shape_cast %65 : vector<1x8x1xf32> to vector<8x1xf32>
      %67 = vector.shape_cast %40 : vector<8x1xf32> to vector<1x8x1xf32>
      tpu.vector_store %arg7[%c0_36, %c0_37, %c0_38], %67 {strides = array<i32>} : memref<4x8x1xf32, #tpu.memory_space<vmem>>, vector<1x8x1xf32>,
      %68 = vector.extract_strided_slice %15 {offsets = [0, 8], sizes = [8, 8], strides = [1, 1]} : vector<8x32xf32> to vector<8x8xf32>
      %69 = vector.extract_strided_slice %17 {offsets = [0, 8], sizes = [8, 8], strides = [1, 1]} : vector<8x32xf32> to vector<8x8xf32>
      %cst_39 = arith.constant dense<0.000000e+00> : vector<8x8xf32>
      %70 = tpu.matmul %68, %69, %cst_39 {dimension_numbers = #tpu.dot_dimension_numbers<[1], [1], [0], [0], [0, 0, 1, 0], [], []>} : vector<8x8xf32>, vector<8x8xf32>, vector<8x8xf32> -> vector<8x8xf32>
      %71 = arith.addf %70, %31 : vector<8x8xf32>
      %c1 = arith.constant 1 : index
      %c0_40 = arith.constant 0 : index
      %c0_41 = arith.constant 0 : index
      %72 = vector.load %arg7[%c1, %c0_40, %c0_41] : memref<4x8x1xf32, #tpu.memory_space<vmem>>, vector<1x8x1xf32>
      %73 = vector.shape_cast %72 : vector<1x8x1xf32> to vector<8x1xf32>
      %cst_42 = arith.constant dense<0xFF800000> : vector<8xf32>
      %74 = vector.multi_reduction <maximumf>, %71, %cst_42 [1] : vector<8x8xf32> to vector<8xf32>
      %75 = vector.shape_cast %74 : vector<8xf32> to vector<8x1xf32>
      %76 = arith.maximumf %73, %75 : vector<8x1xf32>
      %77 = arith.subf %73, %76 : vector<8x1xf32>
      %78 = math.exp %77 : vector<8x1xf32>
      %79 = vector.broadcast %76 : vector<8x1xf32> to vector<8x8xf32>
      %80 = arith.subf %71, %79 : vector<8x8xf32>
      %81 = math.exp %80 : vector<8x8xf32>
      %c1_43 = arith.constant 1 : index
      %c0_44 = arith.constant 0 : index
      %c0_45 = arith.constant 0 : index
      %82 = vector.load %arg8[%c1_43, %c0_44, %c0_45] : memref<4x8x1xf32, #tpu.memory_space<vmem>>, vector<1x8x1xf32>
      %83 = vector.shape_cast %82 : vector<1x8x1xf32> to vector<8x1xf32>
      %84 = arith.mulf %78, %83 : vector<8x1xf32>
      %cst_46 = arith.constant dense<0.000000e+00> : vector<8xf32>
      %85 = vector.multi_reduction <add>, %81, %cst_46 [1] : vector<8x8xf32> to vector<8xf32>
      %86 = vector.shape_cast %85 : vector<8xf32> to vector<8x1xf32>
      %87 = arith.addf %84, %86 : vector<8x1xf32>
      %c1_47 = arith.constant 1 : index
      %c0_48 = arith.constant 0 : index
      %c0_49 = arith.constant 0 : index
      %88 = vector.load %arg8[%c1_47, %c0_48, %c0_49] : memref<4x8x1xf32, #tpu.memory_space<vmem>>, vector<1x8x1xf32>
      %89 = vector.shape_cast %88 : vector<1x8x1xf32> to vector<8x1xf32>
      %90 = vector.shape_cast %87 : vector<8x1xf32> to vector<1x8x1xf32>
      tpu.vector_store %arg8[%c1_47, %c0_48, %c0_49], %90 {strides = array<i32>} : memref<4x8x1xf32, #tpu.memory_space<vmem>>, vector<1x8x1xf32>,
      %c1_50 = arith.constant 1 : index
      %c0_51 = arith.constant 0 : index
      %c0_52 = arith.constant 0 : index
      %91 = vector.load %arg9[%c1_50, %c0_51, %c0_52] : memref<4x8x8xf32, #tpu.memory_space<vmem>>, vector<1x8x8xf32>
      %92 = vector.shape_cast %91 : vector<1x8x8xf32> to vector<8x8xf32>
      %93 = vector.broadcast %78 : vector<8x1xf32> to vector<8x8xf32>
      %94 = arith.mulf %93, %92 : vector<8x8xf32>
      %95 = vector.extract_strided_slice %19 {offsets = [0, 8], sizes = [8, 8], strides = [1, 1]} : vector<8x32xf32> to vector<8x8xf32>
      %cst_53 = arith.constant dense<0.000000e+00> : vector<8x8xf32>
      %96 = tpu.matmul %81, %95, %cst_53 {dimension_numbers = #tpu.dot_dimension_numbers<[1], [0], [0], [1], [0, 0, 1, 1], [], []>} : vector<8x8xf32>, vector<8x8xf32>, vector<8x8xf32> -> vector<8x8xf32>
      %97 = arith.addf %94, %96 : vector<8x8xf32>
      %c1_54 = arith.constant 1 : index
      %c0_55 = arith.constant 0 : index
      %c0_56 = arith.constant 0 : index
      %98 = vector.load %arg9[%c1_54, %c0_55, %c0_56] : memref<4x8x8xf32, #tpu.memory_space<vmem>>, vector<1x8x8xf32>
      %99 = vector.shape_cast %98 : vector<1x8x8xf32> to vector<8x8xf32>
      %100 = vector.shape_cast %97 : vector<8x8xf32> to vector<1x8x8xf32>
      tpu.vector_store %arg9[%c1_54, %c0_55, %c0_56], %100 {strides = array<i32>} : memref<4x8x8xf32, #tpu.memory_space<vmem>>, vector<1x8x8xf32>,
      %c1_57 = arith.constant 1 : index
      %c0_58 = arith.constant 0 : index
      %c0_59 = arith.constant 0 : index
      %101 = vector.load %arg7[%c1_57, %c0_58, %c0_59] : memref<4x8x1xf32, #tpu.memory_space<vmem>>, vector<1x8x1xf32>
      %102 = vector.shape_cast %101 : vector<1x8x1xf32> to vector<8x1xf32>
      %103 = vector.shape_cast %76 : vector<8x1xf32> to vector<1x8x1xf32>
      tpu.vector_store %arg7[%c1_57, %c0_58, %c0_59], %103 {strides = array<i32>} : memref<4x8x1xf32, #tpu.memory_space<vmem>>, vector<1x8x1xf32>,
      %104 = vector.extract_strided_slice %15 {offsets = [0, 16], sizes = [8, 8], strides = [1, 1]} : vector<8x32xf32> to vector<8x8xf32>
      %105 = vector.extract_strided_slice %17 {offsets = [0, 16], sizes = [8, 8], strides = [1, 1]} : vector<8x32xf32> to vector<8x8xf32>
      %cst_60 = arith.constant dense<0.000000e+00> : vector<8x8xf32>
      %106 = tpu.matmul %104, %105, %cst_60 {dimension_numbers = #tpu.dot_dimension_numbers<[1], [1], [0], [0], [0, 0, 1, 0], [], []>} : vector<8x8xf32>, vector<8x8xf32>, vector<8x8xf32> -> vector<8x8xf32>
      %107 = arith.addf %106, %31 : vector<8x8xf32>
      %c2 = arith.constant 2 : index
      %c0_61 = arith.constant 0 : index
      %c0_62 = arith.constant 0 : index
      %108 = vector.load %arg7[%c2, %c0_61, %c0_62] : memref<4x8x1xf32, #tpu.memory_space<vmem>>, vector<1x8x1xf32>
      %109 = vector.shape_cast %108 : vector<1x8x1xf32> to vector<8x1xf32>
      %cst_63 = arith.constant dense<0xFF800000> : vector<8xf32>
      %110 = vector.multi_reduction <maximumf>, %107, %cst_63 [1] : vector<8x8xf32> to vector<8xf32>
      %111 = vector.shape_cast %110 : vector<8xf32> to vector<8x1xf32>
      %112 = arith.maximumf %109, %111 : vector<8x1xf32>
      %113 = arith.subf %109, %112 : vector<8x1xf32>
      %114 = math.exp %113 : vector<8x1xf32>
      %115 = vector.broadcast %112 : vector<8x1xf32> to vector<8x8xf32>
      %116 = arith.subf %107, %115 : vector<8x8xf32>
      %117 = math.exp %116 : vector<8x8xf32>
      %c2_64 = arith.constant 2 : index
      %c0_65 = arith.constant 0 : index
      %c0_66 = arith.constant 0 : index
      %118 = vector.load %arg8[%c2_64, %c0_65, %c0_66] : memref<4x8x1xf32, #tpu.memory_space<vmem>>, vector<1x8x1xf32>
      %119 = vector.shape_cast %118 : vector<1x8x1xf32> to vector<8x1xf32>
      %120 = arith.mulf %114, %119 : vector<8x1xf32>
      %cst_67 = arith.constant dense<0.000000e+00> : vector<8xf32>
      %121 = vector.multi_reduction <add>, %117, %cst_67 [1] : vector<8x8xf32> to vector<8xf32>
      %122 = vector.shape_cast %121 : vector<8xf32> to vector<8x1xf32>
      %123 = arith.addf %120, %122 : vector<8x1xf32>
      %c2_68 = arith.constant 2 : index
      %c0_69 = arith.constant 0 : index
      %c0_70 = arith.constant 0 : index
      %124 = vector.load %arg8[%c2_68, %c0_69, %c0_70] : memref<4x8x1xf32, #tpu.memory_space<vmem>>, vector<1x8x1xf32>
      %125 = vector.shape_cast %124 : vector<1x8x1xf32> to vector<8x1xf32>
      %126 = vector.shape_cast %123 : vector<8x1xf32> to vector<1x8x1xf32>
      tpu.vector_store %arg8[%c2_68, %c0_69, %c0_70], %126 {strides = array<i32>} : memref<4x8x1xf32, #tpu.memory_space<vmem>>, vector<1x8x1xf32>,
      %c2_71 = arith.constant 2 : index
      %c0_72 = arith.constant 0 : index
      %c0_73 = arith.constant 0 : index
      %127 = vector.load %arg9[%c2_71, %c0_72, %c0_73] : memref<4x8x8xf32, #tpu.memory_space<vmem>>, vector<1x8x8xf32>
      %128 = vector.shape_cast %127 : vector<1x8x8xf32> to vector<8x8xf32>
      %129 = vector.broadcast %114 : vector<8x1xf32> to vector<8x8xf32>
      %130 = arith.mulf %129, %128 : vector<8x8xf32>
      %131 = vector.extract_strided_slice %19 {offsets = [0, 16], sizes = [8, 8], strides = [1, 1]} : vector<8x32xf32> to vector<8x8xf32>
      %cst_74 = arith.constant dense<0.000000e+00> : vector<8x8xf32>
      %132 = tpu.matmul %117, %131, %cst_74 {dimension_numbers = #tpu.dot_dimension_numbers<[1], [0], [0], [1], [0, 0, 1, 1], [], []>} : vector<8x8xf32>, vector<8x8xf32>, vector<8x8xf32> -> vector<8x8xf32>
      %133 = arith.addf %130, %132 : vector<8x8xf32>
      %c2_75 = arith.constant 2 : index
      %c0_76 = arith.constant 0 : index
      %c0_77 = arith.constant 0 : index
      %134 = vector.load %arg9[%c2_75, %c0_76, %c0_77] : memref<4x8x8xf32, #tpu.memory_space<vmem>>, vector<1x8x8xf32>
      %135 = vector.shape_cast %134 : vector<1x8x8xf32> to vector<8x8xf32>
      %136 = vector.shape_cast %133 : vector<8x8xf32> to vector<1x8x8xf32>
      tpu.vector_store %arg9[%c2_75, %c0_76, %c0_77], %136 {strides = array<i32>} : memref<4x8x8xf32, #tpu.memory_space<vmem>>, vector<1x8x8xf32>,
      %c2_78 = arith.constant 2 : index
      %c0_79 = arith.constant 0 : index
      %c0_80 = arith.constant 0 : index
      %137 = vector.load %arg7[%c2_78, %c0_79, %c0_80] : memref<4x8x1xf32, #tpu.memory_space<vmem>>, vector<1x8x1xf32>
      %138 = vector.shape_cast %137 : vector<1x8x1xf32> to vector<8x1xf32>
      %139 = vector.shape_cast %112 : vector<8x1xf32> to vector<1x8x1xf32>
      tpu.vector_store %arg7[%c2_78, %c0_79, %c0_80], %139 {strides = array<i32>} : memref<4x8x1xf32, #tpu.memory_space<vmem>>, vector<1x8x1xf32>,
      %140 = vector.extract_strided_slice %15 {offsets = [0, 24], sizes = [8, 8], strides = [1, 1]} : vector<8x32xf32> to vector<8x8xf32>
      %141 = vector.extract_strided_slice %17 {offsets = [0, 24], sizes = [8, 8], strides = [1, 1]} : vector<8x32xf32> to vector<8x8xf32>
      %cst_81 = arith.constant dense<0.000000e+00> : vector<8x8xf32>
      %142 = tpu.matmul %140, %141, %cst_81 {dimension_numbers = #tpu.dot_dimension_numbers<[1], [1], [0], [0], [0, 0, 1, 0], [], []>} : vector<8x8xf32>, vector<8x8xf32>, vector<8x8xf32> -> vector<8x8xf32>
      %143 = arith.addf %142, %31 : vector<8x8xf32>
      %c3 = arith.constant 3 : index
      %c0_82 = arith.constant 0 : index
      %c0_83 = arith.constant 0 : index
      %144 = vector.load %arg7[%c3, %c0_82, %c0_83] : memref<4x8x1xf32, #tpu.memory_space<vmem>>, vector<1x8x1xf32>
      %145 = vector.shape_cast %144 : vector<1x8x1xf32> to vector<8x1xf32>
      %cst_84 = arith.constant dense<0xFF800000> : vector<8xf32>
      %146 = vector.multi_reduction <maximumf>, %143, %cst_84 [1] : vector<8x8xf32> to vector<8xf32>
      %147 = vector.shape_cast %146 : vector<8xf32> to vector<8x1xf32>
      %148 = arith.maximumf %145, %147 : vector<8x1xf32>
      %149 = arith.subf %145, %148 : vector<8x1xf32>
      %150 = math.exp %149 : vector<8x1xf32>
      %151 = vector.broadcast %148 : vector<8x1xf32> to vector<8x8xf32>
      %152 = arith.subf %143, %151 : vector<8x8xf32>
      %153 = math.exp %152 : vector<8x8xf32>
      %c3_85 = arith.constant 3 : index
      %c0_86 = arith.constant 0 : index
      %c0_87 = arith.constant 0 : index
      %154 = vector.load %arg8[%c3_85, %c0_86, %c0_87] : memref<4x8x1xf32, #tpu.memory_space<vmem>>, vector<1x8x1xf32>
      %155 = vector.shape_cast %154 : vector<1x8x1xf32> to vector<8x1xf32>
      %156 = arith.mulf %150, %155 : vector<8x1xf32>
      %cst_88 = arith.constant dense<0.000000e+00> : vector<8xf32>
      %157 = vector.multi_reduction <add>, %153, %cst_88 [1] : vector<8x8xf32> to vector<8xf32>
      %158 = vector.shape_cast %157 : vector<8xf32> to vector<8x1xf32>
      %159 = arith.addf %156, %158 : vector<8x1xf32>
      %c3_89 = arith.constant 3 : index
      %c0_90 = arith.constant 0 : index
      %c0_91 = arith.constant 0 : index
      %160 = vector.load %arg8[%c3_89, %c0_90, %c0_91] : memref<4x8x1xf32, #tpu.memory_space<vmem>>, vector<1x8x1xf32>
      %161 = vector.shape_cast %160 : vector<1x8x1xf32> to vector<8x1xf32>
      %162 = vector.shape_cast %159 : vector<8x1xf32> to vector<1x8x1xf32>
      tpu.vector_store %arg8[%c3_89, %c0_90, %c0_91], %162 {strides = array<i32>} : memref<4x8x1xf32, #tpu.memory_space<vmem>>, vector<1x8x1xf32>,
      %c3_92 = arith.constant 3 : index
      %c0_93 = arith.constant 0 : index
      %c0_94 = arith.constant 0 : index
      %163 = vector.load %arg9[%c3_92, %c0_93, %c0_94] : memref<4x8x8xf32, #tpu.memory_space<vmem>>, vector<1x8x8xf32>
      %164 = vector.shape_cast %163 : vector<1x8x8xf32> to vector<8x8xf32>
      %165 = vector.broadcast %150 : vector<8x1xf32> to vector<8x8xf32>
      %166 = arith.mulf %165, %164 : vector<8x8xf32>
      %167 = vector.extract_strided_slice %19 {offsets = [0, 24], sizes = [8, 8], strides = [1, 1]} : vector<8x32xf32> to vector<8x8xf32>
      %cst_95 = arith.constant dense<0.000000e+00> : vector<8x8xf32>
      %168 = tpu.matmul %153, %167, %cst_95 {dimension_numbers = #tpu.dot_dimension_numbers<[1], [0], [0], [1], [0, 0, 1, 1], [], []>} : vector<8x8xf32>, vector<8x8xf32>, vector<8x8xf32> -> vector<8x8xf32>
      %169 = arith.addf %166, %168 : vector<8x8xf32>
      %c3_96 = arith.constant 3 : index
      %c0_97 = arith.constant 0 : index
      %c0_98 = arith.constant 0 : index
      %170 = vector.load %arg9[%c3_96, %c0_97, %c0_98] : memref<4x8x8xf32, #tpu.memory_space<vmem>>, vector<1x8x8xf32>
      %171 = vector.shape_cast %170 : vector<1x8x8xf32> to vector<8x8xf32>
      %172 = vector.shape_cast %169 : vector<8x8xf32> to vector<1x8x8xf32>
      tpu.vector_store %arg9[%c3_96, %c0_97, %c0_98], %172 {strides = array<i32>} : memref<4x8x8xf32, #tpu.memory_space<vmem>>, vector<1x8x8xf32>,
      %c3_99 = arith.constant 3 : index
      %c0_100 = arith.constant 0 : index
      %c0_101 = arith.constant 0 : index
      %173 = vector.load %arg7[%c3_99, %c0_100, %c0_101] : memref<4x8x1xf32, #tpu.memory_space<vmem>>, vector<1x8x1xf32>
      %174 = vector.shape_cast %173 : vector<1x8x1xf32> to vector<8x1xf32>
      %175 = vector.shape_cast %148 : vector<8x1xf32> to vector<1x8x1xf32>
      tpu.vector_store %arg7[%c3_99, %c0_100, %c0_101], %175 {strides = array<i32>} : memref<4x8x1xf32, #tpu.memory_space<vmem>>, vector<1x8x1xf32>,
    } else {
    }
    %c0_i32_3 = arith.constant 0 : i32
    %9 = arith.cmpi eq, %arg2, %c0_i32_3 : i32
    %10 = arith.extui %9 : i1 to i32
    %c0_i32_4 = arith.constant 0 : i32
    %11 = arith.cmpi ne, %10, %c0_i32_4 : i32
    scf.if %11 {
      %c0 = arith.constant 0 : index
      %c0_5 = arith.constant 0 : index
      %c0_6 = arith.constant 0 : index
      %12 = vector.load %arg8[%c0, %c0_5, %c0_6] : memref<4x8x1xf32, #tpu.memory_space<vmem>>, vector<1x8x1xf32>
      %13 = vector.shape_cast %12 : vector<1x8x1xf32> to vector<8x1xf32>
      %14 = tpu.reciprocal %13 {approx = true} : vector<8x1xf32> -> vector<8x1xf32>
      %c0_7 = arith.constant 0 : index
      %c0_8 = arith.constant 0 : index
      %c0_9 = arith.constant 0 : index
      %15 = vector.load %arg9[%c0_7, %c0_8, %c0_9] : memref<4x8x8xf32, #tpu.memory_space<vmem>>, vector<1x8x8xf32>
      %16 = vector.shape_cast %15 : vector<1x8x8xf32> to vector<8x8xf32>
      %17 = vector.broadcast %14 : vector<8x1xf32> to vector<8x8xf32>
      %18 = arith.mulf %16, %17 : vector<8x8xf32>
      %c0_10 = arith.constant 0 : index
      %c0_11 = arith.constant 0 : index
      %c0_12 = arith.constant 0 : index
      %19 = vector.load %arg6[%c0_10, %c0_11, %c0_12] : memref<1x8x32xf32, #tpu.memory_space<vmem>>, vector<1x8x8xf32>
      %20 = vector.shape_cast %19 : vector<1x8x8xf32> to vector<8x8xf32>
      %21 = vector.shape_cast %18 : vector<8x8xf32> to vector<1x8x8xf32>
      tpu.vector_store %arg6[%c0_10, %c0_11, %c0_12], %21 {strides = array<i32>} : memref<1x8x32xf32, #tpu.memory_space<vmem>>, vector<1x8x8xf32>,
      %c1 = arith.constant 1 : index
      %c0_13 = arith.constant 0 : index
      %c0_14 = arith.constant 0 : index
      %22 = vector.load %arg8[%c1, %c0_13, %c0_14] : memref<4x8x1xf32, #tpu.memory_space<vmem>>, vector<1x8x1xf32>
      %23 = vector.shape_cast %22 : vector<1x8x1xf32> to vector<8x1xf32>
      %24 = tpu.reciprocal %23 {approx = true} : vector<8x1xf32> -> vector<8x1xf32>
      %c1_15 = arith.constant 1 : index
      %c0_16 = arith.constant 0 : index
      %c0_17 = arith.constant 0 : index
      %25 = vector.load %arg9[%c1_15, %c0_16, %c0_17] : memref<4x8x8xf32, #tpu.memory_space<vmem>>, vector<1x8x8xf32>
      %26 = vector.shape_cast %25 : vector<1x8x8xf32> to vector<8x8xf32>
      %27 = vector.broadcast %24 : vector<8x1xf32> to vector<8x8xf32>
      %28 = arith.mulf %26, %27 : vector<8x8xf32>
      %c0_18 = arith.constant 0 : index
      %c0_19 = arith.constant 0 : index
      %c8 = arith.constant 8 : index
      %29 = vector.load %arg6[%c0_18, %c0_19, %c8] : memref<1x8x32xf32, #tpu.memory_space<vmem>>, vector<1x8x8xf32>
      %30 = vector.shape_cast %29 : vector<1x8x8xf32> to vector<8x8xf32>
      %31 = vector.shape_cast %28 : vector<8x8xf32> to vector<1x8x8xf32>
      tpu.vector_store %arg6[%c0_18, %c0_19, %c8], %31 {strides = array<i32>} : memref<1x8x32xf32, #tpu.memory_space<vmem>>, vector<1x8x8xf32>,
      %c2 = arith.constant 2 : index
      %c0_20 = arith.constant 0 : index
      %c0_21 = arith.constant 0 : index
      %32 = vector.load %arg8[%c2, %c0_20, %c0_21] : memref<4x8x1xf32, #tpu.memory_space<vmem>>, vector<1x8x1xf32>
      %33 = vector.shape_cast %32 : vector<1x8x1xf32> to vector<8x1xf32>
      %34 = tpu.reciprocal %33 {approx = true} : vector<8x1xf32> -> vector<8x1xf32>
      %c2_22 = arith.constant 2 : index
      %c0_23 = arith.constant 0 : index
      %c0_24 = arith.constant 0 : index
      %35 = vector.load %arg9[%c2_22, %c0_23, %c0_24] : memref<4x8x8xf32, #tpu.memory_space<vmem>>, vector<1x8x8xf32>
      %36 = vector.shape_cast %35 : vector<1x8x8xf32> to vector<8x8xf32>
      %37 = vector.broadcast %34 : vector<8x1xf32> to vector<8x8xf32>
      %38 = arith.mulf %36, %37 : vector<8x8xf32>
      %c0_25 = arith.constant 0 : index
      %c0_26 = arith.constant 0 : index
      %c16 = arith.constant 16 : index
      %39 = vector.load %arg6[%c0_25, %c0_26, %c16] : memref<1x8x32xf32, #tpu.memory_space<vmem>>, vector<1x8x8xf32>
      %40 = vector.shape_cast %39 : vector<1x8x8xf32> to vector<8x8xf32>
      %41 = vector.shape_cast %38 : vector<8x8xf32> to vector<1x8x8xf32>
      tpu.vector_store %arg6[%c0_25, %c0_26, %c16], %41 {strides = array<i32>} : memref<1x8x32xf32, #tpu.memory_space<vmem>>, vector<1x8x8xf32>,
      %c3 = arith.constant 3 : index
      %c0_27 = arith.constant 0 : index
      %c0_28 = arith.constant 0 : index
      %42 = vector.load %arg8[%c3, %c0_27, %c0_28] : memref<4x8x1xf32, #tpu.memory_space<vmem>>, vector<1x8x1xf32>
      %43 = vector.shape_cast %42 : vector<1x8x1xf32> to vector<8x1xf32>
      %44 = tpu.reciprocal %43 {approx = true} : vector<8x1xf32> -> vector<8x1xf32>
      %c3_29 = arith.constant 3 : index
      %c0_30 = arith.constant 0 : index
      %c0_31 = arith.constant 0 : index
      %45 = vector.load %arg9[%c3_29, %c0_30, %c0_31] : memref<4x8x8xf32, #tpu.memory_space<vmem>>, vector<1x8x8xf32>
      %46 = vector.shape_cast %45 : vector<1x8x8xf32> to vector<8x8xf32>
      %47 = vector.broadcast %44 : vector<8x1xf32> to vector<8x8xf32>
      %48 = arith.mulf %46, %47 : vector<8x8xf32>
      %c0_32 = arith.constant 0 : index
      %c0_33 = arith.constant 0 : index
      %c24 = arith.constant 24 : index
      %49 = vector.load %arg6[%c0_32, %c0_33, %c24] : memref<1x8x32xf32, #tpu.memory_space<vmem>>, vector<1x8x8xf32>
      %50 = vector.shape_cast %49 : vector<1x8x8xf32> to vector<8x8xf32>
      %51 = vector.shape_cast %48 : vector<8x8xf32> to vector<1x8x8xf32>
      tpu.vector_store %arg6[%c0_32, %c0_33, %c24], %51 {strides = array<i32>} : memref<1x8x32xf32, #tpu.memory_space<vmem>>, vector<1x8x8xf32>,
    } else {
    }
    return
  }
  func.func @transform_0(%arg0: i32, %arg1: i32, %arg2: i32) -> (i32, i32, i32) {
    %c0_i32 = arith.constant 0 : i32
    %c0_i32_0 = arith.constant 0 : i32
    return %arg0, %arg1, %c0_i32 : i32, i32, i32
  }
  func.func @transform_1(%arg0: i32, %arg1: i32, %arg2: i32) -> (i32, i32, i32) {
    %c0_i32 = arith.constant 0 : i32
    %c0_i32_0 = arith.constant 0 : i32
    return %arg0, %arg2, %c0_i32 : i32, i32, i32
  }
  func.func @transform_2(%arg0: i32, %arg1: i32, %arg2: i32) -> (i32, i32, i32) {
    %c0_i32 = arith.constant 0 : i32
    %c0_i32_0 = arith.constant 0 : i32
    return %arg0, %arg2, %c0_i32 : i32, i32, i32
  }
  func.func @transform_3(%arg0: i32, %arg1: i32, %arg2: i32) -> (i32, i32, i32) {
    %c0_i32 = arith.constant 0 : i32
    %c0_i32_0 = arith.constant 0 : i32
    return %arg0, %arg1, %c0_i32 : i32, i32, i32
  }
}

</mosaic_0001>

<bundles_post_ra>
// kernel: tpu_custom_call.1
= control target key start
LH: loop header
LB: loop body
LE: loop exit
PB: predicated region body
PF: predicated region fallthrough
CT: control target
= control target key end

     0   :  { %s2007_s0 = inlined_call_operand.hbm [shape: f32[2,8,32], index: 0, kind: input, shape index: {}]   ;;  %s2008_s1 = inlined_call_operand.hbm [shape: f32[2,8,32], index: 1, kind: input, shape index: {}]   ;;  %s2009_s2 = inlined_call_operand.hbm [shape: f32[2,8,32], index: 2, kind: input, shape index: {}]   ;;  %s2010_s3 = inlined_call_operand.hbm [shape: f32[2,8,32], index: 3, kind: output, shape index: {}]  }
   0x1   :  { %2014 = sst [smem:[#allocation17_spill]] %s2008_s1 }
   0x2   :  { %8 = vsyncpa [#allocation6], 0 }
   0x3   :  { %10 = vsyncpa [#allocation6 + $0x1], 0 }
   0x4   :  { %11 = vsyncpa [#allocation9], 0 }
   0x5   :  { %13 = vsyncpa [#allocation9 + $0x1], 0 }
   0x6   :  { %14 = vsyncpa [#allocation7], 0 }
   0x7   :  { %16 = vsyncpa [#allocation7 + $0x1], 0  ;;  %s1688_s12 = smov 0   ;;  %s1690_s13 = smov 0  }
   0x8   :  { %s1692_s14 = smov 0   ;;  %s1694_s15 = smov 0  }
   0x9   :  { %s1696_s16 = smov 0   ;;  %s1698_s17 = smov 0  }
   0xa LB: > { %2015 = sst [smem:[#allocation15_spill]] %s1648_s16  ;;  %s1719_s18 = sadd.s32 4294967295, %s1652_s17   ;;  %s1652_s17 = sphi %s1698_s17, %s22_s17   ;;  %s1648_s16 = sphi %s1696_s16, %s2027_s16   ;;  %s1644_s15 = sphi %s1694_s15, %s2026_s15   ;;  %s1640_s14 = sphi %s1692_s14, %s2030_s14   ;;  %s1636_s13 = sphi %s1690_s13, %s2029_s13   ;;  %s1632_s12 = sphi %s1688_s12, %s2028_s12  }
   0xb   : > { %s1290_s19 = sadd.s32 4294967294, %s1652_s17   ;;  %s41_s20 = sadd.s32 1, %s1648_s16 }
   0xc   : > { %s50_s21 = sadd.s32 1, %s1640_s14  ;;  %p43_p0 = scmp.ge.s32.totalorder %s41_s20, 2 }
   0xd   : > { %p57_p1 = scmp.ne.s32.totalorder %s1640_s14, %s1636_s13  ;;  %p58_p2 = scmp.eq.s32.totalorder %s1652_s17, 0 }
   0xe   : > { %p63_p3 = scmp.ne.s32.totalorder %s1636_s13, %s1632_s12  ;;  %s2032_s20 = smov (%p43_p0, %s41_s20), 0 }
   0xf   : > { %2016 = sst [smem:[#allocation16_spill]] %s2032_s20  ;;  %p1731_p4 = por %p58_p2, %p57_p1 }
  0x10   : > { %p64_p5 = scmp.eq.s32.totalorder %s1719_s18, 0  ;;  %s45_s23 = ssub.s32 %s1648_s16, %s2032_s20 }
  0x11   : > { %p145_p6 = scmp.eq.s32.totalorder %s1719_s18, 1  ;;  %p48_p7 = scmp.eq.s32.totalorder %s45_s23, 0 }
  0x12   : > { %p1739_p8 = por %p64_p5, %p63_p3  ;;  %p151_p10 = scmp.eq.s32.totalorder %s1290_s19, 1 }
  0x13   : > { %p1743_p9 = por %p145_p6, %p57_p1  ;;  %p1398_p13 = scmp.lt.s32.totalorder %s1652_s17, 2 }
  0x14   : > { %s1748_s26 = scalar_select %p48_p7, %s1640_s14, %s50_s21  }
  0x15   : > { %p1750_p11 = por %p151_p10, %p63_p3  ;;  %s2011_s28 = sand.u32 1, %s1640_s14  }
  0x16   : > { %s1759_s29 = sshll.u32 %s2011_s28, 3  ;;  %s1762_s30 = sshll.u32 %s1648_s16, 7 }
  0x17   : > { %p1766_p0 = pnand %p1398_p13, %p1731_p4  ;;  %s190_s5 = sand.u32 1, %s1652_s17  }
  0x18   : > { %s2022_s1 = sld [smem:[#allocation17_spill]]  ;;  %s194_s9 = scalar_lea.vmem [#allocation8], %s1759_s29 }
  0x19   : > { %s202_s10 = sshll.u32 %s194_s9, 4  ;;  %p1299_p1 = scmp.ge.s32.totalorder %s1652_s17, 1  ;;  %s203_s10 = int_to_ptr.vmem [resolvable:$true] %s202_s10 }
  0x1a   : > { %p226_p2 = scmp.lt.s32.totalorder %s1652_s17, 3  ;;  %s1778_s11 = scalar_lea.sflag [#allocation9], %s190_s5 }
  0x1b   : > { %p1486_p3 = pneg %p1766_p0  ;;  %s1497_s19 = scalar_lea.vmem %s203_s10, 128 }
  0x1c   : > { %p1498_p4 = scmp.ne.s32.totalorder %s203_s10, %s1497_s19  ;;  %s1654_s21 = smov [#allocation8]  }
  0x1d   : > { %s1502_s22 = sshll.u32 %s1654_s21, 4  ;;  %s1503_s22 = int_to_ptr.vmem [resolvable:$false] %s1502_s22 }
  0x1e   : > { %s200_s8 = scalar_lea.hbm %s2022_s1, %s1762_s30  ;;  %p1500_p5 = pnand %p1498_p4, %p1486_p3 }
  0x1f   : > { %s1504_s23 = scalar_lea.vmem %s1503_s22, 256  ;;  %p1505_p7 = scmp.lt.s32.totalorder %s203_s10, %s1503_s22 }
  0x20   : > { %p1501_p6 = pneg %p1500_p5  ;;  %p1506_p10 = scmp.lt.s32.totalorder %s1504_s23, %s1497_s19 }
  0x22   : > { %p1507_p13 = por %p1506_p10, %p1505_p7 }
  0x24   : > { %p1508_p12 = pnand %p1507_p13, %p1501_p6 }
  0x26   : > { %1511 = shalt.err (!%p1508_p12)
}
  0x27   : > { %1390 = dma.hbm_to_vmem [thread:$0]  (!%p1766_p0), %s200_s8, 128, %s203_s10, %s1778_s11  }
  0x28   : > { %p1792_p4 = pnand %p1299_p1, %p226_p2  ;;  %s181_s9 = scalar_lea.hbm %s2007_s0, %s1762_s30 }
  0x29   : > { %s175_s19 = scalar_lea.vmem [#allocation5], %s1759_s29  ;;  %s219_s28 = scalar_lea.hbm %s2009_s2, %s1762_s30 }
  0x2a   : > { %s183_s21 = sshll.u32 %s175_s19, 4  ;;  %s2024_s1 = sand.u32 1, %s1640_s14   ;;  %s184_s21 = int_to_ptr.vmem [resolvable:$true] %s183_s21 }
  0x2b   : > { %s172_s20 = scalar_lea.sflag [#allocation6], %s2024_s1  ;;  %s1525_s8 = scalar_lea.vmem %s184_s21, 128 }
  0x2c   : > { %p1526_p12 = scmp.ne.s32.totalorder %s184_s21, %s1525_s8  ;;  %s1655_s10 = smov [#allocation5]  }
  0x2d   : > { %s1530_s16 = sshll.u32 %s1655_s10, 4  ;;  %s1531_s16 = int_to_ptr.vmem [resolvable:$false] %s1530_s16 }
  0x2e   : > { %p1528_p1 = pnand %p1526_p12, %p1486_p3  ;;  %s1532_s6 = scalar_lea.vmem %s1531_s16, 256 }
  0x2f   : > { %p1533_p5 = scmp.lt.s32.totalorder %s184_s21, %s1531_s16  ;;  %p1534_p6 = scmp.lt.s32.totalorder %s1532_s6, %s1525_s8 }
  0x30   : > { %p1529_p2 = pneg %p1528_p1 }
  0x31   : > { %p1535_p7 = por %p1534_p6, %p1533_p5 }
  0x33   : > { %p1536_p10 = pnand %p1535_p7, %p1529_p2 }
  0x35   : > { %1539 = shalt.err (!%p1536_p10)
}
  0x36   : > { %1387 = dma.hbm_to_vmem [thread:$0]  (!%p1766_p0), %s181_s9, 128, %s184_s21, %s172_s20  }
  0x37   : > { %s213_s1 = scalar_lea.vmem [#allocation10], %s1759_s29  ;;  %s1656_s22 = smov [#allocation10]  }
  0x38   : > { %s221_s7 = sshll.u32 %s213_s1, 4  ;;  %s1558_s16 = sshll.u32 %s1656_s22, 4  ;;  %s222_s7 = int_to_ptr.vmem [resolvable:$true] %s221_s7  ;;  %s1559_s16 = int_to_ptr.vmem [resolvable:$false] %s1558_s16 }
  0x39   : > { %s1553_s19 = scalar_lea.vmem %s222_s7, 128  ;;  %s1560_s23 = scalar_lea.vmem %s1559_s16, 256 }
  0x3a   : > { %p1554_p13 = scmp.ne.s32.totalorder %s222_s7, %s1553_s19  ;;  %p1561_p2 = scmp.lt.s32.totalorder %s222_s7, %s1559_s16 }
  0x3b   : > { %p1562_p5 = scmp.lt.s32.totalorder %s1560_s23, %s1553_s19 }
  0x3c   : > { %p1556_p12 = pnand %p1554_p13, %p1486_p3 }
  0x3d   : > { %p1563_p6 = por %p1562_p5, %p1561_p2 }
  0x3e   : > { %p1557_p1 = pneg %p1556_p12 }
  0x40   : > { %p1564_p7 = pnand %p1563_p6, %p1557_p1 }
  0x42   : > { %1567 = shalt.err (!%p1564_p7)
}
  0x43   : > { %1393 = dma.hbm_to_vmem [thread:$0]  (!%p1766_p0), %s219_s28, 128, %s222_s7, %s1778_s11  }
  0x44   : > { %230 = sbr.rel (%p1792_p4) target bundleno = 1468 (0x5bc), region = 32  ;;  %s1827_s9 = sand.u32 (!%p1792_p4), 1, %s1636_s13  }
  0x45   : > { %s1830_s21 = sshll.u32 (!%p1792_p4), %s1827_s9, 3  ;;  %s233_s4 = scalar_lea.sflag (!%p1792_p4), [#allocation6], %s1827_s9 }
  0x46   : > { %s236_s8 = scalar_lea.vmem (!%p1792_p4), [#allocation5], %s1830_s21 }
  0x49   : > { %1619 = dma.done.wait (%p1739_p8), %s233_s4, 128  }
  0x4a   : > { %1621 = vsyncadd (%p1739_p8), %s233_s4, 4294967168  ;;  %s241_s28 = sand.u32 1, %s1719_s18   ;;  %s245_s11 = scalar_lea.vmem [#allocation8], %s1830_s21 }
  0x4b   : > { %s242_s30 = scalar_lea.sflag [#allocation9], %s241_s28 }
  0x4c   : > { %1623 = dma.done.wait (%p1739_p8), %s242_s30, 256  }
  0x4d   : > { %1625 = vsyncadd (%p1739_p8), %s242_s30, 4294967040  ;;  %vm300_vm0 = vcmask 64512   ;;  %v1657_v0 = vmov 0.0   ;;  %vm1658_vm1 = vmmov 0   ;;  %v314_v1 = vld [vmem:[%s245_s11] sm:$0xff]  ;;  %v312_v2 = vld [vmem:[%s236_s8] sm:$0xff]  ;;  %v316_v5 = vlaneseq }
  0x4e   : > { %1336 = vmatprep.subr.mxu0 %v1657_v0  ;;  %301 = vst.msk [vmem:[#allocation4] sm:$0xff] %vm300_vm0, %v1657_v0  ;;  %302 = vst.msk [vmem:[#allocation4 + $0x8] sm:$0xff] %vm300_vm0, %v1657_v0  ;;  %1338 = vmatprep.mubr.msk.f32.mxu0 %vm1658_vm1, %v1657_v0  ;;  %v313_v3 = vmul.f32 0.35355338, %v312_v2  ;;  %vm291_vm2 = vcmask 7168   ;;  %v1659_v4 = vmov -inf  }
  0x4f   : > { %303 = vst.msk [vmem:[#allocation4 + $0x10] sm:$0xff] %vm300_vm0, %v1657_v0  ;;  %304 = vst.msk [vmem:[#allocation4 + $0x18] sm:$0xff] %vm300_vm0, %v1657_v0  ;;  %1341 = vmatprep.subr.mxu1 %v1657_v0  ;;  %1343 = vmatprep.mubr.msk.f32.mxu1 %vm1658_vm1, %v1657_v0  ;;  %v317_v6 = vshrl.u32 %v316_v5, 7  ;;  %v321_v7 = vand.u32 127, %v316_v5  ;;  %v1660_v13 = vmov 0   ;;  %s1661_s18 = smov 120  }
  0x50   : > { %1337 = vmatpush3.xpose.msk.msra.mxu0 %vm300_vm0, %v314_v1  ;;  %292 = vst.msk [vmem:[#allocation2] sm:$0xff] %vm291_vm2, %v1659_v4  ;;  %293 = vst.msk [vmem:[#allocation2 + $0x8] sm:$0xff] %vm291_vm2, %v1659_v4  ;;  %1458 = vset.pattern.permute.xlu0 %v1660_v13  ;;  %s1662_s24 = smov 112   ;;  %s1663_s5 = smov 104   ;;  %vm1110_vm4 = vcmask 130112   ;;  %vm1127_vm5 = vcmask 195712  }
  0x51   : > { %1351 = vmatprep.subr.mxu0 %v1657_v0  ;;  %294 = vst.msk [vmem:[#allocation2 + $0x10] sm:$0xff] %vm291_vm2, %v1659_v4  ;;  %295 = vst.msk [vmem:[#allocation2 + $0x18] sm:$0xff] %vm291_vm2, %v1659_v4  ;;  %vm324_vm3 = vcmp.gt.s32.totalorder %v321_v7, %v317_v6  ;;  %1459 = vset.pattern.permute.xlu1 %v1660_v13  ;;  %s254_s10 = scalar_lea.vmem [#allocation10], %s1830_s21  ;;  %s1952_s6 = scalar_lea.vmem [#allocation11], %s1830_s21  ;;  %vm1144_vm6 = vcmask 261312  }
  0x52   : > { %296 = vst.msk [vmem:[#allocation3] sm:$0xff] %vm291_vm2, %v1657_v0  ;;  %297 = vst.msk [vmem:[#allocation3 + $0x8] sm:$0xff] %vm291_vm2, %v1657_v0  ;;  %v1876_v8 = vsel %vm324_vm3, -10000.0, %v1657_v0  ;;  %512 = vrot.lane.b32.xlu1 %v314_v1, %s1661_s18  ;;  %v315_v18 = vld [vmem:[%s254_s10] sm:$0xff]  ;;  %s1664_s1 = smov 8   ;;  %s1665_s7 = smov 16  }
  0x53   : > { %1339 = vmatmul.mubr.msk.f32.vlgmr.msra.gmra.mxu0 %vm300_vm0, %v313_v3  ;;  %298 = vst.msk [vmem:[#allocation3 + $0x10] sm:$0xff] %vm291_vm2, %v1657_v0  ;;  %299 = vst.msk [vmem:[#allocation3 + $0x18] sm:$0xff] %vm291_vm2, %v1657_v0  ;;  %1342 = vmatpush3.msra.mxu1 %v315_v18  ;;  %s1666_s19 = smov 24   ;;  %s1317_s22 = sshll.u32 %s1644_s15, 7 }
  0x54   : > { %1353 = vmatprep.mubr.msk.f32.mxu0 %vm1658_vm1, %v1657_v0  ;;  %1346 = vmatprep.subr.mxu1 %v1657_v0  ;;  %s1161_s16 = sshll.u32 %s1952_s6, 4  ;;  %s1964_s29 = scalar_lea.hbm %s2010_s3, %s1317_s22  ;;  %s1162_s16 = int_to_ptr.vmem [resolvable:$true] %s1161_s16 }
  0x55   : > { %s1147_s21 = scalar_lea.sflag [#allocation7], %s1827_s9  ;;  %s1568_s4 = scalar_lea.vmem %s1162_s16, 128 }
  0x56   : > { %510 = vrot.lane.b32.xlu1 %v313_v3, %s1661_s18  ;;  %p1569_p8 = scmp.ne.s32.totalorder %s1162_s16, %s1568_s4  ;;  %s1667_s8 = smov [#allocation11]  }
  0x57   : > { %v1886_v14 = vld [vmem:[#allocation2] sm:$0xff]  ;;  %v589_v43 = vld [vmem:[#allocation2 + $0x8] sm:$0xff]  ;;  %s1572_s28 = sshll.u32 %s1667_s8, 4  ;;  %s1573_s28 = int_to_ptr.vmem [resolvable:$false] %s1572_s28 }
  0x58   : > { %v780_v46 = vld [vmem:[#allocation2 + $0x10] sm:$0xff]  ;;  %v970_v50 = vld [vmem:[#allocation2 + $0x18] sm:$0xff]  ;;  %p1570_p0 = pnand %p1569_p8, %p1743_p9  ;;  %s1574_s15 = scalar_lea.vmem %s1573_s28, 256 }
  0x59   : > { %p1575_p4 = scmp.lt.s32.totalorder %s1162_s16, %s1573_s28  ;;  %p1576_p10 = scmp.lt.s32.totalorder %s1574_s15, %s1568_s4 }
  0x5a   : > { %703 = vrot.lane.b32.xlu1 %v314_v1, %s1662_s24  ;;  %p1571_p3 = pneg %p1570_p0 }
  0x5b   : > { %p1577_p13 = por %p1576_p10, %p1575_p4 }
  0x5d   : > { %p1578_p12 = pnand %p1577_p13, %p1571_p3 }
  0x5e   : > { %701 = vrot.lane.b32.xlu1 %v313_v3, %s1662_s24 }
  0x62   : > { %893 = vrot.lane.b32.xlu1 %v314_v1, %s1663_s5 }
  0x66   : > { %891 = vrot.lane.b32.xlu1 %v313_v3, %s1663_s5 }
  0xc4   : > { %v513_v19 = vpop.permute.xlu1 %512 }
  0xc8   : > { %v511_v23 = vpop.permute.xlu1 %510 }
  0xcc   : > { %v704_v24 = vpop.permute.xlu1 %703 }
  0xd0   : > { %v702_v25 = vpop.permute.xlu1 %701 }
  0xd4   : > { %v894_v27 = vpop.permute.xlu1 %893 }
  0xd8   : > { %v892_v28 = vpop.permute.xlu1 %891 }
 0x113   : > { %v399_v9 = vpop.f32.mrf.mxu0 }
 0x114   : > { %v400_v10 = vadd.f32 %v399_v9, %v1876_v8 }
 0x115   : > { %v1340_v11 = vpop.f32.mrf.mxu0 }
 0x116   : > { %v404_v12 = vsel %vm300_vm0, %v400_v10, -inf }
 0x117   : > { %405 = vmax.xlane.f32.xlu0 %v404_v12 }
 0x1a0   : > { %v406_v15 = vpop.xlane.xlu0 %405 }
 0x1a1   : > { %v1889_v16 = vmax.f32 %v1886_v14, %v406_v15 }
 0x1a3   : > { %v408_v17 = vsub.f32 %v1886_v14, %v1889_v16  ;;  %509 = vst.msk [vmem:[#allocation2] sm:$0xff] %vm291_vm2, %v1889_v16  ;;  %413 = vperm.xlu0 %1458, %v1889_v16   ;;  %v606_v16 = vld [vmem:[#allocation3 + $0x8] sm:$0xff] }
 0x1a5   : > { %v409_v13 = vmul.f32 1.442695, %v408_v17 }
 0x21e   : > { %v414_v20 = vpop.permute.xlu0 %413 }
 0x21f   : > { %v416_v21 = vsub.f32 %v400_v10, %v414_v20 }
 0x221   : > { %v417_v22 = vmul.f32 1.442695, %v416_v21  ;;  %v419_v21 = vld [vmem:[#allocation3] sm:$0xff] }
 0x223   : > { %1460 = vpow2.f32 %v417_v22 }
 0x230   : > { %v1461_v26 = vpop.eup %1460 }
 0x231   : > { %1344 = vmatmul.mubr.msk.f32.vlgmr.msra.gmra.mxu1 %vm300_vm0, %v1461_v26  ;;  %v421_v55 = vsel %vm300_vm0, %v1461_v26, 0.0 }
 0x232   : > { %1347 = vmatpush3.xpose.msk.msra.mxu1 %vm300_vm0, %v513_v19  ;;  %1348 = vmatprep.mubr.msk.f32.mxu1 %vm1658_vm1, %v1657_v0 }
 0x233   : > { %1356 = vmatprep.subr.mxu1 %v1657_v0 }
 0x235   : > { %1349 = vmatmul.mubr.msk.f32.vlgmr.msra.gmra.mxu1 %vm300_vm0, %v511_v23 }
 0x236   : > { %1357 = vmatpush3.xpose.msk.msra.mxu1 %vm300_vm0, %v704_v24  ;;  %1358 = vmatprep.mubr.msk.f32.mxu1 %vm1658_vm1, %v1657_v0 }
 0x237   : > { %1366 = vmatprep.subr.mxu1 %v1657_v0 }
 0x239   : > { %1359 = vmatmul.mubr.msk.f32.vlgmr.msra.gmra.mxu1 %vm300_vm0, %v702_v25 }
 0x23a   : > { %1367 = vmatpush3.xpose.msk.msra.mxu1 %vm300_vm0, %v894_v27  ;;  %1368 = vmatprep.mubr.msk.f32.mxu1 %vm1658_vm1, %v1657_v0  ;;  %v797_v27 = vld [vmem:[#allocation3 + $0x10] sm:$0xff] }
 0x23d   : > { %1369 = vmatmul.mubr.msk.f32.vlgmr.msra.gmra.mxu1 %vm300_vm0, %v892_v28 }
 0x2f1   : > { %v1913_v29 = vpop.f32.mrf.mxu1 }
 0x2f3   : > { %v1345_v30 = vpop.f32.mrf.mxu1 }
 0x2f5   : > { %v584_v31 = vpop.f32.mrf.mxu1 }
 0x2f6   : > { %v585_v32 = vadd.f32 %v584_v31, %v1876_v8 }
 0x2f7   : > { %v1350_v33 = vpop.f32.mrf.mxu1 }
 0x2f8   : > { %v590_v34 = vsel %vm300_vm0, %v585_v32, -inf }
 0x2f9   : > { %591 = vmax.xlane.f32.xlu1 %v590_v34  ;;  %v775_v35 = vpop.f32.mrf.mxu1 }
 0x2fa   : > { %v776_v36 = vadd.f32 %v775_v35, %v1876_v8 }
 0x2fb   : > { %v1360_v37 = vpop.f32.mrf.mxu1 }
 0x2fc   : > { %v781_v38 = vsel %vm300_vm0, %v776_v36, -inf }
 0x2fd   : > { %782 = vmax.xlane.f32.xlu0 %v781_v38  ;;  %v965_v39 = vpop.f32.mrf.mxu1  ;;  %v427_v38 = vld [vmem:[#allocation4] sm:$0xff] }
 0x2fe   : > { %v966_v40 = vadd.f32 %v965_v39, %v1876_v8 }
 0x2ff   : > { %v1370_v41 = vpop.f32.mrf.mxu1 }
 0x300   : > { %v971_v42 = vsel %vm300_vm0, %v966_v40, -inf }
 0x301   : > { %972 = vmax.xlane.f32.xlu1 %v971_v42 }
 0x382   : > { %v592_v44 = vpop.xlane.xlu1 %591 }
 0x383   : > { %v593_v45 = vmax.f32 %v589_v43, %v592_v44 }
 0x385   : > { %v594_v47 = vsub.f32 %v589_v43, %v593_v45  ;;  %700 = vst.msk [vmem:[#allocation2 + $0x8] sm:$0xff] %vm291_vm2, %v593_v45  ;;  %599 = vperm.xlu1 %1459, %v593_v45  }
 0x386   : > { %v783_v48 = vpop.xlane.xlu0 %782 }
 0x387   : > { %v784_v49 = vmax.f32 %v780_v46, %v783_v48  ;;  %v595_v8 = vmul.f32 1.442695, %v594_v47  ;;  %v614_v47 = vld [vmem:[#allocation4 + $0x8] sm:$0xff] }
 0x389   : > { %v785_v51 = vsub.f32 %v780_v46, %v784_v49  ;;  %890 = vst.msk [vmem:[#allocation2 + $0x10] sm:$0xff] %vm291_vm2, %v784_v49  ;;  %790 = vperm.xlu0 %1458, %v784_v49  }
 0x38a   : > { %v973_v52 = vpop.xlane.xlu1 %972 }
 0x38b   : > { %v974_v53 = vmax.f32 %v970_v50, %v973_v52  ;;  %v786_v15 = vmul.f32 1.442695, %v785_v51 }
 0x38d   : > { %v975_v54 = vsub.f32 %v970_v50, %v974_v53  ;;  %1080 = vst.msk [vmem:[#allocation2 + $0x18] sm:$0xff] %vm291_vm2, %v974_v53  ;;  %980 = vperm.xlu1 %1459, %v974_v53   ;;  %v805_v50 = vld [vmem:[#allocation4 + $0x10] sm:$0xff] }
 0x38f   : > { %v976_v11 = vmul.f32 1.442695, %v975_v54 }
 0x391   : > { %622 = vrot.lane.b32.xlu1 %v315_v18, %s1661_s18 }
 0x395   : > { %812 = vrot.lane.b32.xlu1 %v315_v18, %s1662_s24 }
 0x399   : > { %1002 = vrot.lane.b32.xlu1 %v315_v18, %s1663_s5 }
 0x3bd   : > { %422 = vadd.xlane.f32.xlu1 %v421_v55 }
 0x400   : > { %v600_v56 = vpop.permute.xlu1 %599 }
 0x401   : > { %v602_v57 = vsub.f32 %v585_v32, %v600_v56  ;;  %v987_v32 = vld [vmem:[#allocation3 + $0x18] sm:$0xff] }
 0x402   : > { %v995_v56 = vld [vmem:[#allocation4 + $0x18] sm:$0xff] }
 0x403   : > { %v603_v58 = vmul.f32 1.442695, %v602_v57 }
 0x404   : > { %v791_v59 = vpop.permute.xlu0 %790 }
 0x405   : > { %1462 = vpow2.f32 %v603_v58  ;;  %v793_v60 = vsub.f32 %v776_v36, %v791_v59 }
 0x407   : > { %v794_v61 = vmul.f32 1.442695, %v793_v60 }
 0x408   : > { %v981_v62 = vpop.permute.xlu1 %980 }
 0x409   : > { %1464 = vpow2.f32 %v794_v61  ;;  %v983_v63 = vsub.f32 %v966_v40, %v981_v62 }
 0x40b   : > { %v984_v1 = vmul.f32 1.442695, %v983_v63 }
 0x40c   : > { %v623_v2 = vpop.permute.xlu1 %622 }
 0x40d   : > { %1466 = vpow2.f32 %v984_v1  ;;  %1352 = vmatpush3.msra.mxu0 %v623_v2 }
 0x40e   : > { %1361 = vmatprep.subr.mxu0 %v1657_v0  ;;  %1468 = vpow2.f32 %v595_v8 }
 0x40f   : > { %1470 = vpow2.f32 %v976_v11 }
 0x410   : > { %v813_v3 = vpop.permute.xlu1 %812  ;;  %1472 = vpow2.f32 %v409_v13 }
 0x411   : > { %1474 = vpow2.f32 %v786_v15 }
 0x412   : > { %v1463_v4 = vpop.eup %1462 }
 0x413   : > { %1354 = vmatmul.mubr.msk.f32.vlgmr.msra.gmra.mxu0 %vm300_vm0, %v1463_v4  ;;  %v608_v5 = vsel %vm300_vm0, %v1463_v4, 0.0 }
 0x414   : > { %609 = vadd.xlane.f32.xlu0 %v608_v5  ;;  %1362 = vmatpush3.msra.mxu0 %v813_v3  ;;  %v1003_v6 = vpop.permute.xlu1 %1002 }
 0x415   : > { %1363 = vmatprep.mubr.msk.f32.mxu0 %vm1658_vm1, %v1657_v0  ;;  %1371 = vmatprep.subr.mxu0 %v1657_v0 }
 0x416   : > { %v1465_v7 = vpop.eup %1464 }
 0x417   : > { %1364 = vmatmul.mubr.msk.f32.vlgmr.msra.gmra.mxu0 %vm300_vm0, %v1465_v7  ;;  %v799_v9 = vsel %vm300_vm0, %v1465_v7, 0.0 }
 0x418   : > { %800 = vadd.xlane.f32.xlu1 %v799_v9  ;;  %1372 = vmatpush3.msra.mxu0 %v1003_v6 }
 0x419   : > { %1373 = vmatprep.mubr.msk.f32.mxu0 %vm1658_vm1, %v1657_v0 }
 0x41a   : > { %v1467_v10 = vpop.eup %1466 }
 0x41b   : > { %1374 = vmatmul.mubr.msk.f32.vlgmr.msra.gmra.mxu0 %vm300_vm0, %v1467_v10  ;;  %v989_v12 = vsel %vm300_vm0, %v1467_v10, 0.0  ;;  %v1469_v18 = vpop.eup %1468 }
 0x41c   : > { %990 = vadd.xlane.f32.xlu0 %v989_v12  ;;  %v1471_v19 = vpop.eup %1470  ;;  %v607_v17 = vmul.f32 %v1469_v18, %v606_v16 }
 0x41d   : > { %v1473_v0 = vpop.eup %1472  ;;  %v988_v34 = vmul.f32 %v1471_v19, %v987_v32 }
 0x41e   : > { %v1475_v20 = vpop.eup %1474  ;;  %v420_v22 = vmul.f32 %v1473_v0, %v419_v21 }
 0x41f   : > { %v798_v30 = vmul.f32 %v1475_v20, %v797_v27 }
 0x429   : > { %617 = vperm.xlu1 %1459, %v1469_v18  }
 0x42d   : > { %998 = vperm.xlu1 %1459, %v1471_v19  }
 0x432   : > { %430 = vperm.xlu0 %1458, %v1473_v0  }
 0x436   : > { %808 = vperm.xlu0 %1458, %v1475_v20  }
 0x446   : > { %v423_v23 = vpop.xlane.xlu1 %422 }
 0x447   : > { %v424_v24 = vadd.f32 %v423_v23, %v420_v22 }
 0x449   : > { %426 = vst.msk [vmem:[#allocation3] sm:$0xff] %vm291_vm2, %v424_v24 }
 0x450   : > { %v1084_v25 = vld [vmem:[#allocation3] sm:$0xff] }
 0x451   : > { %1476 = vrcp.f32 %v1084_v25 }
 0x45e   : > { %v1477_v14 = vpop.eup %1476 }
 0x45f   : > { %1089 = vperm.xlu1 %1459, %v1477_v14  }
 0x49d   : > { %v610_v26 = vpop.xlane.xlu0 %609 }
 0x49e   : > { %v611_v28 = vadd.f32 %v610_v26, %v607_v17 }
 0x4a0   : > { %612 = vst.msk [vmem:[#allocation3 + $0x8] sm:$0xff] %vm291_vm2, %v611_v28 }
 0x4a1   : > { %v801_v31 = vpop.xlane.xlu1 %800 }
 0x4a2   : > { %v802_v33 = vadd.f32 %v801_v31, %v798_v30 }
 0x4a4   : > { %803 = vst.msk [vmem:[#allocation3 + $0x10] sm:$0xff] %vm291_vm2, %v802_v33 }
 0x4a5   : > { %v991_v35 = vpop.xlane.xlu0 %990  ;;  %v618_v48 = vpop.permute.xlu1 %617 }
 0x4a6   : > { %v992_v36 = vadd.f32 %v991_v35, %v988_v34  ;;  %v620_v49 = vmul.f32 %v618_v48, %v614_v47 }
 0x4a7   : > { %v1096_v37 = vld [vmem:[#allocation3 + $0x8] sm:$0xff] }
 0x4a8   : > { %993 = vst.msk [vmem:[#allocation3 + $0x18] sm:$0xff] %vm291_vm2, %v992_v36  ;;  %1478 = vrcp.f32 %v1096_v37 }
 0x4a9   : > { %v999_v55 = vpop.permute.xlu1 %998 }
 0x4aa   : > { %v1001_v60 = vmul.f32 %v999_v55, %v995_v56 }
 0x4ab   : > { %v1113_v39 = vld [vmem:[#allocation3 + $0x10] sm:$0xff] }
 0x4ac   : > { %1480 = vrcp.f32 %v1113_v39 }
 0x4ad   : > { %v431_v40 = vpop.permute.xlu0 %430 }
 0x4ae   : > { %v433_v41 = vmul.f32 %v431_v40, %v427_v38 }
 0x4af   : > { %v1130_v42 = vld [vmem:[#allocation3 + $0x18] sm:$0xff] }
 0x4b0   : > { %v507_v43 = vadd.f32 %v1913_v29, %v433_v41  ;;  %1482 = vrcp.f32 %v1130_v42 }
 0x4b1   : > { %v809_v51 = vpop.permute.xlu0 %808 }
 0x4b2   : > { %508 = vst.msk [vmem:[#allocation4] sm:$0xff] %vm300_vm0, %v507_v43  ;;  %v811_v29 = vmul.f32 %v809_v51, %v805_v50 }
 0x4b5   : > { %v1479_v44 = vpop.eup %1478 }
 0x4b6   : > { %1102 = vperm.xlu0 %1458, %v1479_v44  }
 0x4b9   : > { %v1481_v45 = vpop.eup %1480  ;;  %v1086_v61 = vld [vmem:[#allocation4] sm:$0xff] }
 0x4ba   : > { %1119 = vperm.xlu0 %1458, %v1481_v45  }
 0x4bd   : > { %v1483_v46 = vpop.eup %1482 }
 0x4be   : > { %1136 = vperm.xlu0 %1458, %v1483_v46  }
 0x4d3   : > { %v694_v52 = vpop.f32.mrf.mxu0 }
 0x4d4   : > { %v698_v53 = vadd.f32 %v694_v52, %v620_v49 }
 0x4d5   : > { %v1355_v54 = vpop.f32.mrf.mxu0 }
 0x4d6   : > { %699 = vst.msk [vmem:[#allocation4 + $0x8] sm:$0xff] %vm300_vm0, %v698_v53 }
 0x4d7   : > { %v884_v57 = vpop.f32.mrf.mxu0 }
 0x4d8   : > { %v888_v58 = vadd.f32 %v884_v57, %v811_v29 }
 0x4d9   : > { %v1365_v59 = vpop.f32.mrf.mxu0 }
 0x4da   : > { %889 = vst.msk [vmem:[#allocation4 + $0x10] sm:$0xff] %vm300_vm0, %v888_v58  ;;  %v1090_v62 = vpop.permute.xlu1 %1089 }
 0x4db   : > { %v1092_v63 = vmul.f32 %v1090_v62, %v1086_v61  ;;  %v1074_v1 = vpop.f32.mrf.mxu0 }
 0x4dc   : > { %v1078_v2 = vadd.f32 %v1074_v1, %v1001_v60 }
 0x4dd   : > { %1094 = vst.msk [vmem:[%s1952_s6] sm:$0xff] %vm300_vm0, %v1092_v63  ;;  %v1375_v3 = vpop.f32.mrf.mxu0  ;;  %v1099_v4 = vld [vmem:[#allocation4 + $0x8] sm:$0xff] }
 0x4de   : > { %1079 = vst.msk [vmem:[#allocation4 + $0x18] sm:$0xff] %vm300_vm0, %v1078_v2 }
 0x4e1   : > { %v1116_v7 = vld [vmem:[#allocation4 + $0x10] sm:$0xff] }
 0x4e5   : > { %v1133_v10 = vld [vmem:[#allocation4 + $0x18] sm:$0xff] }
 0x531   : > { %v1103_v5 = vpop.permute.xlu0 %1102 }
 0x532   : > { %v1105_v6 = vmul.f32 %v1103_v5, %v1099_v4 }
 0x534   : > { %1107 = vrot.lane.b32.xlu1 %v1105_v6, %s1664_s1 }
 0x535   : > { %v1120_v8 = vpop.permute.xlu0 %1119 }
 0x536   : > { %v1122_v9 = vmul.f32 %v1120_v8, %v1116_v7 }
 0x538   : > { %1124 = vrot.lane.b32.xlu1 %v1122_v9, %s1665_s7 }
 0x539   : > { %v1137_v11 = vpop.permute.xlu0 %1136 }
 0x53a   : > { %v1139_v12 = vmul.f32 %v1137_v11, %v1133_v10 }
 0x53c   : > { %1141 = vrot.lane.b32.xlu1 %v1139_v12, %s1666_s19 }
 0x5a6   : > { %v1108_v13 = vpop.permute.xlu1 %1107 }
 0x5a7   : > { %1111 = vst.msk [vmem:[%s1952_s6] sm:$0xff] %vm1110_vm4, %v1108_v13 }
 0x5aa   : > { %v1125_v15 = vpop.permute.xlu1 %1124 }
 0x5ab   : > { %1128 = vst.msk [vmem:[%s1952_s6] sm:$0xff] %vm1127_vm5, %v1125_v15 }
 0x5ae   : > { %v1142_v18 = vpop.permute.xlu1 %1141 }
 0x5af   : > { %1145 = vst.msk [vmem:[%s1952_s6] sm:$0xff] %vm1144_vm6, %v1142_v18 }
 0x5b0   : > { %1581 = shalt.err (!%p1578_p12)
}
 0x5b1   : > { %s1582_s30 = scalar_lea.hbm %s1964_s29, 128  ;;  %s1586_s18 = scalar_lea.hbm %s2010_s3, 256 }
 0x5b2   : > { %p1583_p1 = scmp.ne.s32.totalorder %s1964_s29, %s1582_s30  ;;  %p1587_p6 = scmp.lt.s32.totalorder %s1964_s29, %s2010_s3 }
 0x5b3   : > { %p1588_p7 = scmp.lt.s32.totalorder %s1586_s18, %s1582_s30 }
 0x5b4   : > { %p1584_p2 = pnand %p1583_p1, %p1743_p9 }
 0x5b5   : > { %p1589_p8 = por %p1588_p7, %p1587_p6 }
 0x5b6   : > { %p1585_p5 = pneg %p1584_p2 }
 0x5b8   : > { %p1590_p0 = pnand %p1589_p8, %p1585_p5 }
 0x5ba   : > { %1593 = shalt.err (!%p1590_p0)
}
 0x5bb   : > { %1382 = dma.vmem_to_hbm [thread:$0]  (%p1743_p9), %s1162_s16, 128, %s1964_s29, %s1147_s21  }
 0x5bc PF: > { %s1173_s10 = sand.u32 1, %s1632_s12   ;;  %p2025_p3 = scmp.ge.s32.totalorder %s1652_s17, 2 }
 0x5bd   : > { %s1174_s6 = scalar_lea.sflag [#allocation7], %s1173_s10 }
 0x5be   : > { %p1395_p4 = pnand %p2025_p3, %p1750_p11 }
 0x5c0   : > { %p1396_p10 = pneg %p1395_p4 }
 0x5c2   : > { %1627 = dma.done.wait (%p1396_p10), %s1174_s6, 128  }
 0x5c3   : > { %1629 = vsyncadd (%p1396_p10), %s1174_s6, 4294967168  ;;  %s22_s17 = sadd.s32 1, %s1652_s17   ;;  %s2026_s15 = sld [smem:[#allocation15_spill]] }
 0x5c4   : > { %p19_p13 = scmp.ge.s32.totalorder %s22_s17, 4   ;;  %s2027_s16 = sld [smem:[#allocation16_spill]] }
 0x5c5   : > { %s2028_s12 = smov %s1636_s13  ;;  %s2029_s13 = smov %s1640_s14 }
 0x5c6   : > { %s2030_s14 = smov %s1748_s26  ;;  %21 = sbr.rel (!%p19_p13) target bundleno = 10 (0xa), region = 128 }
 0x5cb   :  { %1179 = vsyncpa [#allocation6], 1 }
 0x5cc   :  { %1181 = vsyncpa [#allocation6 + $0x1], 1 }
 0x5cd   :  { %1182 = vsyncpa [#allocation9], 1 }
 0x5ce   :  { %1184 = vsyncpa [#allocation9 + $0x1], 1 }
 0x5cf   :  { %1185 = vsyncpa [#allocation7], 1 }
 0x5d0   :  { %1187 = vsyncpa [#allocation7 + $0x1], 1 }

</bundles_post_ra>
